<compile_context>
chip_gen: v7x
topology: tpu7x:2x2x1
jax: 0.10.0
libtpu: 0.0.40
codegen_flags: <defaults>
</compile_context>

<pallas_src>
import math

import numpy as np

import jax
import jax.numpy as jnp
from jax.experimental import pallas as pl
from jax.experimental.pallas import tpu as pltpu

up_kwargs = {"mode": "bilinear", "align_corners": True}

_LANE = 128
# Pipeline-buffer budget per kernel (inputs+outputs, double-buffered).  16 MiB
# fits inside every generation's scoped VMEM (v5e default 16 MiB, v6e/v7x
# default 32 MiB) with headroom for compiler scratch.
_VMEM_PIPELINE_BUDGET = 16 * 1024 * 1024
_VMEM_LIMIT = 32 * 1024 * 1024  # safe on v5e/v6e (128 MiB) and v7x (64 MiB)


def _round_up(x, m):
    return ((x + m - 1) // m) * m


def _pick_tile_p(rows_per_step, p):
    """Largest lane tile (multiple of 128) such that the double-buffered
    pipelined blocks (rows_per_step total f32 rows per grid step) stay inside
    the VMEM budget.  Never larger than P rounded up to a lane multiple."""
    max_tp = _VMEM_PIPELINE_BUDGET // (2 * rows_per_step * 4)
    max_tp = max(_LANE, (max_tp // _LANE) * _LANE)
    return int(min(max_tp, _round_up(p, _LANE)))


# ----------------------------------------------------------------------------
# Pallas kernels (hot paths)
# ----------------------------------------------------------------------------
def _proj_kernel_fma(x_ref, w_ref, b_ref, o_ref):
    """Small-Cin projection on the VPU: o = sum_k w[:,k] * x[k,:] + b.

    x: (Cin, TP)  w: (Cout, Cin)  b: (Cout, 1)  ->  o: (Cout, TP)
    Cin is tiny (3), so K is unrolled into broadcast multiply-adds; no MXU.
    """
    x = x_ref[...]
    w = w_ref[...]
    b = b_ref[...]
    cout, cin = w.shape
    tp = x.shape[1]
    acc = jnp.broadcast_to(b, (cout, tp))
    for k in range(cin):  # static unroll, Cin is small
        acc = acc + w[:, k:k + 1] * x[k:k + 1, :]
    o_ref[...] = acc


def _proj_kernel_mxu(x_ref, w_ref, b_ref, o_ref):
    """Large-Cin projection on the MXU (lane-dense output)."""
    o_ref[...] = (
        jnp.dot(w_ref[...], x_ref[...], preferred_element_type=jnp.float32)
        + b_ref[...]
    )


def conv1x1_pallas(x_nchw, weight, bias):
    """Per-pixel linear projection (1x1 conv), tiled over the pixel dim.

    Layout: (Cout, P) = (Cout, Cin) @ (Cin, P) + (Cout, 1) so the big
    dimension P sits on the lane axis of both input and output blocks
    (unmasked vector stores), and no in-kernel transpose is needed.
    """
    n, c, h, w = x_nchw.shape
    cout = weight.shape[0]
    p = n * h * w

    x2d = jnp.transpose(x_nchw, (1, 0, 2, 3)).reshape(c, p).astype(jnp.float32)
    w2d = weight.astype(jnp.float32)             # (Cout, Cin), used directly
    b2d = bias.reshape(cout, 1).astype(jnp.float32)

    tp = _pick_tile_p(rows_per_step=c + cout, p=p)
    p_pad = _round_up(p, tp)
    if p_pad != p:
        x2d = jnp.pad(x2d, ((0, 0), (0, p_pad - p)))

    kernel = _proj_kernel_fma if c < 128 else _proj_kernel_mxu

    out2d = pl.pallas_call(
        kernel,
        out_shape=jax.ShapeDtypeStruct((cout, p_pad), jnp.float32),
        grid=(p_pad // tp,),
        in_specs=[
            pl.BlockSpec((c, tp), lambda i: (0, i)),       # pixel-tiled input
            pl.BlockSpec((cout, c), lambda i: (0, 0)),     # resident weight
            pl.BlockSpec((cout, 1), lambda i: (0, 0)),     # resident bias col
        ],
        out_specs=pl.BlockSpec((cout, tp), lambda i: (0, i)),
        compiler_params=pltpu.CompilerParams(
            dimension_semantics=("parallel",),
            vmem_limit_bytes=_VMEM_LIMIT,
        ),
    )(x2d, w2d, b2d)

    out2d = out2d[:, :p]
    return jnp.transpose(out2d.reshape(cout, n, h, w), (1, 0, 2, 3))


def _avg2_kernel(a_ref, b_ref, o_ref):
    o_ref[...] = (a_ref[...] + b_ref[...]) * 0.5


def avg2_pallas(a_nchw, b_nchw):
    """(a + b) / 2 elementwise (flip-averaged inference), pixel-tiled."""
    n, c, h, w = a_nchw.shape
    p = n * h * w
    a2 = jnp.transpose(a_nchw, (1, 0, 2, 3)).reshape(c, p).astype(jnp.float32)
    b2 = jnp.transpose(b_nchw, (1, 0, 2, 3)).reshape(c, p).astype(jnp.float32)

    tp = _pick_tile_p(rows_per_step=3 * c, p=p)
    p_pad = _round_up(p, tp)
    if p_pad != p:
        a2 = jnp.pad(a2, ((0, 0), (0, p_pad - p)))
        b2 = jnp.pad(b2, ((0, 0), (0, p_pad - p)))

    out = pl.pallas_call(
        _avg2_kernel,
        out_shape=jax.ShapeDtypeStruct((c, p_pad), jnp.float32),
        grid=(p_pad // tp,),
        in_specs=[
            pl.BlockSpec((c, tp), lambda i: (0, i)),
            pl.BlockSpec((c, tp), lambda i: (0, i)),
        ],
        out_specs=pl.BlockSpec((c, tp), lambda i: (0, i)),
        compiler_params=pltpu.CompilerParams(
            dimension_semantics=("parallel",),
            vmem_limit_bytes=_VMEM_LIMIT,
        ),
    )(a2, b2)

    out = out[:, :p]
    return jnp.transpose(out.reshape(c, n, h, w), (1, 0, 2, 3))


# ----------------------------------------------------------------------------
# Glue (faithful ports of the PyTorch helpers, fully traceable / jittable)
# ----------------------------------------------------------------------------
def crop_image(img, h0, h1, w0, w1):
    return img[:, :, h0:h1, w0:w1]


def flip_image(img):
    assert img.ndim == 4
    return img[:, :, :, ::-1]


def module_inference(module, image, label_set, flip=True):
    # NOTE: for the synthetic 1x1-conv head the flip pass is mathematically a
    # no-op (flip(conv(flip(x))) == conv(x)); it is kept to preserve the
    # reference module's forward semantics for an arbitrary `module`.
    def get_pred(x):
        pred = module(x, label_set)
        if isinstance(pred, (tuple, list)):
            pred = pred[0]
        return pred

    output = get_pred(image)
    if flip:
        fimg = flip_image(image)
        foutput = get_pred(fimg)
        output = avg2_pallas(output, flip_image(foutput))
    return output


def pad_image(img, mean, std, crop_size):
    b, c, h, w = img.shape
    assert c == 3
    padh = crop_size - h if h < crop_size else 0
    padw = crop_size - w if w < crop_size else 0
    pad_values = [-m / s for m, s in zip(mean, std)]
    chans = []
    for i in range(c):
        chans.append(
            jnp.pad(img[:, i, :, :], ((0, 0), (0, padh), (0, padw)),
                    constant_values=pad_values[i])
        )
    img_pad = jnp.stack(chans, axis=1)
    assert img_pad.shape[2] >= crop_size and img_pad.shape[3] >= crop_size
    return img_pad


def resize_hw_max(h, w, long_size=520):
    if h > w:
        height = long_size
        width = int(1.0 * w * long_size / h + 0.5)
        short_size = width
    else:
        width = long_size
        height = int(1.0 * h * long_size / w + 0.5)
        short_size = height
    return (height, width, short_size)


def resize_image(img, out_h, out_w, **kwargs):
    """Bilinear resize with align_corners=True (matches F.interpolate)."""
    n, c, h, w = img.shape
    img = img.astype(jnp.float32)

    def coords(out_size, in_size):
        if out_size == 1:
            src = jnp.zeros((1,), jnp.float32)
        else:
            src = jnp.arange(out_size, dtype=jnp.float32) * (
                (in_size - 1) / (out_size - 1)
            )
        lo = jnp.clip(jnp.floor(src), 0, in_size - 1).astype(jnp.int32)
        hi = jnp.clip(lo + 1, 0, in_size - 1)
        frac = src - lo.astype(jnp.float32)
        return lo, hi, frac

    y0, y1, fy = coords(out_h, h)
    x0, x1, fx = coords(out_w, w)
    top = jnp.take(img, y0, axis=2)
    bot = jnp.take(img, y1, axis=2)
    v00 = jnp.take(top, x0, axis=3)
    v01 = jnp.take(top, x1, axis=3)
    v10 = jnp.take(bot, x0, axis=3)
    v11 = jnp.take(bot, x1, axis=3)
    fy = fy[None, None, :, None]
    fx = fx[None, None, None, :]
    return (v00 * (1 - fy) * (1 - fx) + v01 * (1 - fy) * fx
            + v10 * fy * (1 - fx) + v11 * fy * fx)


# ----------------------------------------------------------------------------
# Synthetic segmentation net (stand-in for the LSeg backbone+head):
# a per-pixel 1x1 conv from 3 input channels to nclass output channels.
# ----------------------------------------------------------------------------
class SyntheticLSegNet:
    def __init__(self, key, in_ch, nclass):
        kw, kb = jax.random.split(key)
        self.weight = jax.random.normal(kw, (nclass, in_ch), jnp.float32) * 0.1
        self.bias = jax.random.normal(kb, (nclass,), jnp.float32) * 0.1

    def __call__(self, x, label_set=None):
        return conv1x1_pallas(x, self.weight, self.bias)


# ----------------------------------------------------------------------------
# LSegMultiEvalModule — faithful port of the PyTorch forward semantics
# ----------------------------------------------------------------------------
class LSegMultiEvalModule:
    """Multi-size Segmentation Evaluator (JAX/Pallas port)."""

    def __init__(self, net, max_size=520, flip=True,
                 scales=(0.5, 0.75, 1.0, 1.25, 1.5, 1.75)):
        self.max_size = max_size
        self.crop_size = max_size
        self.mean = [0.5, 0.5, 0.5]
        self.std = [0.5, 0.5, 0.5]
        self._up_kwargs = up_kwargs
        self.scales = list(scales)
        self.flip = flip
        self.net = net

    def single_forward(self, image, label_set=None):
        batch, _, height, width = image.shape
        assert batch == 1
        self.nclass = 512 if label_set is None else len(label_set)
        stride_rate = 2.0 / 3.0
        crop_size = self.crop_size
        stride = int(crop_size * stride_rate)
        long_size, short_size = (height, width) if height > width else (width, height)
        if long_size <= crop_size:
            pad_img = pad_image(image, self.mean, self.std, crop_size)
            outputs = module_inference(self.net, pad_img, label_set, self.flip)
            outputs = crop_image(outputs, 0, height, 0, width)
        else:
            if short_size < crop_size:
                pad_img = pad_image(image, self.mean, self.std, crop_size)
            else:
                pad_img = image
            _, _, ph, pw = pad_img.shape
            assert ph >= height and pw >= width
            h_grids = int(math.ceil(1.0 * (ph - crop_size) / stride)) + 1
            w_grids = int(math.ceil(1.0 * (pw - crop_size) / stride)) + 1
            outputs = jnp.zeros((batch, self.nclass, ph, pw), jnp.float32)
            # count_norm is fully determined by static window geometry:
            # compute it host-side (no device scatter, no device-sync assert).
            count_norm_np = np.zeros((batch, 1, ph, pw), np.float32)
            for idh in range(h_grids):
                for idw in range(w_grids):
                    h0 = idh * stride
                    w0 = idw * stride
                    h1 = min(h0 + crop_size, ph)
                    w1 = min(w0 + crop_size, pw)
                    crop_img = crop_image(pad_img, h0, h1, w0, w1)
                    pad_crop_img = pad_image(crop_img, self.mean, self.std, crop_size)
                    output = module_inference(self.net, pad_crop_img,
                                              label_set, self.flip)
                    outputs = outputs.at[:, :, h0:h1, w0:w1].add(
                        crop_image(output, 0, h1 - h0, 0, w1 - w0))
                    count_norm_np[:, :, h0:h1, w0:w1] += 1.0
            assert (count_norm_np == 0).sum() == 0  # host-side, static
            outputs = outputs / jnp.asarray(count_norm_np)
            outputs = outputs[:, :, :height, :width]
        return outputs

    def forward(self, image, label_set=None):
        """Multi-size evaluation."""
        batch, _, h, w = image.shape
        assert batch == 1
        self.nclass = 512 if label_set is None else len(label_set)
        scores = jnp.zeros((batch, self.nclass, h, w), jnp.float32)
        for scale in self.scales:
            long_size = int(math.ceil(self.max_size * scale))
            height, width, short_size = resize_hw_max(h, w, long_size)
            cur_img = resize_image(image, height, width, **self._up_kwargs)
            outputs = self.single_forward(cur_img, label_set)
            score = resize_image(outputs, h, w, **self._up_kwargs)
            scores = scores + score
        scores = scores / len(self.scales)
        return scores

    # TODO(synk): encode_text delegates to net.encode_text (a CLIP text tower);
    # not part of the image forward pass and not implemented here.


# ----------------------------------------------------------------------------
# main
# ----------------------------------------------------------------------------
if __name__ == "__main__":
    key = jax.random.PRNGKey(0)
    k_img, k_net = jax.random.split(key)

    # Small but representative config: 16x16 RGB image, crop/max size 16,
    # scales chosen so both single_forward branches run
    # (scale 0.5 / 1.0 -> pad path, scale 1.5 -> sliding-window path).
    H = W = 16
    label_set = ["wall", "floor", "sky", "tree", "person", "car", "dog", "cat"]
    nclass = len(label_set)

    image = jax.random.normal(k_img, (1, 3, H, W), jnp.float32)
    net = SyntheticLSegNet(k_net, in_ch=3, nclass=nclass)

    # Quick correctness checks of the Pallas kernels vs plain-JAX references.
    ref_proj = (jnp.einsum("oc,nchw->nohw", net.weight, image)
                + net.bias[None, :, None, None])
    got_proj = conv1x1_pallas(image, net.weight, net.bias)
    assert bool(jnp.allclose(got_proj, ref_proj, atol=1e-4, rtol=1e-4))
    a = jax.random.normal(jax.random.PRNGKey(1), (1, nclass, H, W), jnp.float32)
    b = jax.random.normal(jax.random.PRNGKey(2), (1, nclass, H, W), jnp.float32)
    assert bool(jnp.allclose(avg2_pallas(a, b), (a + b) * 0.5, atol=1e-6))

    evaluator = LSegMultiEvalModule(net, max_size=16, flip=True,
                                    scales=[0.5, 1.0, 1.5])

    # Jit the whole multi-scale forward so all glue (pads, bilinear gathers,
    # window scatters, layout reshapes) fuses around the pallas_calls.
    run = jax.jit(lambda img: evaluator.forward(img, label_set))
    scores = jax.block_until_ready(run(image))

    assert scores.shape == (1, nclass, H, W)
    assert bool(jnp.all(jnp.isfinite(scores)))
    print("KERNEL_OK")
</pallas_src>

<mosaic_0001>
module attributes {stable_mosaic.version = 11 : i64} {
  func.func @_proj_kernel_fma(%arg0: i32, %arg1: memref<3x256xf32, #tpu.memory_space<vmem>>, %arg2: memref<8x3xf32, #tpu.memory_space<vmem>>, %arg3: memref<8x1xf32, #tpu.memory_space<vmem>>, %arg4: memref<8x256xf32, #tpu.memory_space<vmem>>) attributes {dimension_semantics = [#tpu.dimension_semantics<parallel>], iteration_bounds = array<i64: 1>, scalar_prefetch = 0 : i64, scratch_operands = 0 : i64, tpu.core_type = #tpu.core_type<tc>, window_params = [{transform_indices = @transform_0, window_bounds = array<i64: 3, 256>}, {pipeline_mode = #tpu.pipeline_mode<synchronous>, transform_indices = @transform_1, window_bounds = array<i64: 8, 3>}, {pipeline_mode = #tpu.pipeline_mode<synchronous>, transform_indices = @transform_2, window_bounds = array<i64: 8, 1>}, {transform_indices = @transform_3, window_bounds = array<i64: 8, 256>}]} {
    %c0 = arith.constant 0 : index
    %c0_0 = arith.constant 0 : index
    %0 = vector.load %arg1[%c0, %c0_0] : memref<3x256xf32, #tpu.memory_space<vmem>>, vector<3x256xf32>
    %c0_1 = arith.constant 0 : index
    %c0_2 = arith.constant 0 : index
    %1 = vector.load %arg2[%c0_1, %c0_2] : memref<8x3xf32, #tpu.memory_space<vmem>>, vector<8x3xf32>
    %c0_3 = arith.constant 0 : index
    %c0_4 = arith.constant 0 : index
    %2 = vector.load %arg3[%c0_3, %c0_4] : memref<8x1xf32, #tpu.memory_space<vmem>>, vector<8x1xf32>
    %3 = vector.shape_cast %2 : vector<8x1xf32> to vector<8x1xf32>
    %4 = vector.broadcast %3 : vector<8x1xf32> to vector<8x256xf32>
    %5 = vector.extract_strided_slice %1 {offsets = [0, 0], sizes = [8, 1], strides = [1, 1]} : vector<8x3xf32> to vector<8x1xf32>
    %6 = vector.extract_strided_slice %0 {offsets = [0, 0], sizes = [1, 256], strides = [1, 1]} : vector<3x256xf32> to vector<1x256xf32>
    %7 = vector.broadcast %5 : vector<8x1xf32> to vector<8x256xf32>
    %8 = vector.broadcast %6 : vector<1x256xf32> to vector<8x256xf32>
    %9 = arith.mulf %7, %8 : vector<8x256xf32>
    %10 = arith.addf %4, %9 : vector<8x256xf32>
    %11 = vector.extract_strided_slice %1 {offsets = [0, 1], sizes = [8, 1], strides = [1, 1]} : vector<8x3xf32> to vector<8x1xf32>
    %12 = vector.extract_strided_slice %0 {offsets = [1, 0], sizes = [1, 256], strides = [1, 1]} : vector<3x256xf32> to vector<1x256xf32>
    %13 = vector.broadcast %11 : vector<8x1xf32> to vector<8x256xf32>
    %14 = vector.broadcast %12 : vector<1x256xf32> to vector<8x256xf32>
    %15 = arith.mulf %13, %14 : vector<8x256xf32>
    %16 = arith.addf %10, %15 : vector<8x256xf32>
    %17 = vector.extract_strided_slice %1 {offsets = [0, 2], sizes = [8, 1], strides = [1, 1]} : vector<8x3xf32> to vector<8x1xf32>
    %18 = vector.extract_strided_slice %0 {offsets = [2, 0], sizes = [1, 256], strides = [1, 1]} : vector<3x256xf32> to vector<1x256xf32>
    %19 = vector.broadcast %17 : vector<8x1xf32> to vector<8x256xf32>
    %20 = vector.broadcast %18 : vector<1x256xf32> to vector<8x256xf32>
    %21 = arith.mulf %19, %20 : vector<8x256xf32>
    %22 = arith.addf %16, %21 : vector<8x256xf32>
    %c0_5 = arith.constant 0 : index
    %c0_6 = arith.constant 0 : index
    %23 = vector.load %arg4[%c0_5, %c0_6] : memref<8x256xf32, #tpu.memory_space<vmem>>, vector<8x256xf32>
    tpu.vector_store %arg4[%c0_5, %c0_6], %22 {strides = array<i32>} : memref<8x256xf32, #tpu.memory_space<vmem>>, vector<8x256xf32>,
    return
  }
  func.func @transform_0(%arg0: i32) -> (i32, i32) {
    %c0_i32 = arith.constant 0 : i32
    %c0_i32_0 = arith.constant 0 : i32
    return %c0_i32, %arg0 : i32, i32
  }
  func.func @transform_1(%arg0: i32) -> (i32, i32) {
    %c0_i32 = arith.constant 0 : i32
    %c0_i32_0 = arith.constant 0 : i32
    %c0_i32_1 = arith.constant 0 : i32
    return %c0_i32, %c0_i32_0 : i32, i32
  }
  func.func @transform_2(%arg0: i32) -> (i32, i32) {
    %c0_i32 = arith.constant 0 : i32
    %c0_i32_0 = arith.constant 0 : i32
    %c0_i32_1 = arith.constant 0 : i32
    return %c0_i32, %c0_i32_0 : i32, i32
  }
  func.func @transform_3(%arg0: i32) -> (i32, i32) {
    %c0_i32 = arith.constant 0 : i32
    %c0_i32_0 = arith.constant 0 : i32
    return %c0_i32, %arg0 : i32, i32
  }
}

</mosaic_0001>

<bundles_post_ra>
// kernel: tpu_custom_call.1
= control target key start
LH: loop header
LB: loop body
LE: loop exit
PB: predicated region body
PF: predicated region fallthrough
CT: control target
= control target key end

     0   :  { %v151_v1 = vmov 0   ;;  %v152_v2 = vmov 1   ;;  %s196_s0 = inlined_call_operand.vmem [shape: f32[3,256], index: 0, kind: input, shape index: {}]   ;;  %s197_s1 = inlined_call_operand.vmem [shape: f32[8,3], index: 1, kind: input, shape index: {}]   ;;  %s198_s2 = inlined_call_operand.vmem [shape: f32[8,1], index: 2, kind: input, shape index: {}]   ;;  %s199_s3 = inlined_call_operand.hbm [shape: f32[8,256], index: 3, kind: output, shape index: {}]  }
   0x1   :  { %v16_v0 = vld [vmem:[%s197_s1] sm:$0xff]  ;;  %123 = vset.pattern.permute.xlu0 %v151_v1  ;;  %124 = vset.pattern.permute.xlu1 %v152_v2 }
   0x2   :  { %8 = vsyncpa [#allocation3], 0  ;;  %25 = vperm.xlu0 %123, %v16_v0   ;;  %52 = vperm.xlu1 %124, %v16_v0   ;;  %v17_v3 = vld [vmem:[%s198_s2] sm:$0xff]  ;;  %v153_v4 = vmov 2   ;;  %v29_v5 = vlaneseq }
   0x3   :  { %v15_v9 = vld [vmem:[%s196_s0] sm:$0x77]  ;;  %s154_s0 = smov [#allocation2]  }
   0x4   :  { %v30_v6 = vshrl.u32 %v29_v5, 7  ;;  %s111_s2 = sshll.u32 %s154_s0, 4  ;;  %s112_s2 = int_to_ptr.vmem [resolvable:$true] %s111_s2 }
   0x5   :  { %s127_s17 = scalar_lea.vmem %s112_s2, 256  ;;  %p132_p1 = scmp.lt.s32.totalorder %s112_s2, %s112_s2 }
   0x6   :  { %20 = vperm.xlu0 %123, %v17_v3   ;;  %125 = vset.pattern.permute.xlu1 %v153_v4  ;;  %v31_v7 = vsub.s32 0, %v30_v6  ;;  %v35_v8 = vsub.s32 4, %v30_v6  ;;  %v57_v10 = vsub.s32 1, %v30_v6  ;;  %v61_v11 = vsub.s32 5, %v30_v6  ;;  %p128_p0 = scmp.ne.s32.totalorder %s112_s2, %s127_s17  ;;  %p133_p2 = scmp.lt.s32.totalorder %s127_s17, %s127_s17 }
   0x7   :  { %78 = vperm.xlu1 %125, %v16_v0   ;;  %v83_v12 = vsub.s32 2, %v30_v6  ;;  %v87_v13 = vsub.s32 6, %v30_v6 }
   0x8   :  { %v32_v14 = vrot.slane %v15_v9, %v31_v7  ;;  %v36_v15 = vrot.slane %v15_v9, %v35_v8  ;;  %v58_v16 = vrot.slane %v15_v9, %v57_v10  ;;  %v62_v17 = vrot.slane %v15_v9, %v61_v11  ;;  %p134_p3 = por %p133_p2, %p132_p1 }
   0x9   :  { %v84_v18 = vrot.slane %v15_v9, %v83_v12  ;;  %v88_v19 = vrot.slane %v15_v9, %v87_v13 }
   0xa   :  { %126 = vset.pattern.permute.xlu0 %v153_v4  ;;  %v42_v20 = vrot.slane %v32_v14, %v31_v7  ;;  %v46_v21 = vrot.slane %v36_v15, %v31_v7  ;;  %v68_v24 = vrot.slane %v58_v16, %v57_v10  ;;  %v72_v25 = vrot.slane %v62_v17, %v57_v10  ;;  %p135_p4 = pnand %p134_p3, %p128_p0 }
   0xb   :  { %v94_v26 = vrot.slane %v84_v18, %v83_v12  ;;  %v98_v27 = vrot.slane %v88_v19, %v83_v12 }
  0x81   :  { %v26_v22 = vpop.permute.xlu0 %25  ;;  %v53_v23 = vpop.permute.xlu1 %52 }
  0x82   :  { %v47_v28 = vmul.f32 %v42_v20, %v26_v22  ;;  %v48_v29 = vmul.f32 %v46_v21, %v26_v22  ;;  %v73_v31 = vmul.f32 %v68_v24, %v53_v23  ;;  %v74_v32 = vmul.f32 %v72_v25, %v53_v23 }
  0x85   :  { %v21_v30 = vpop.permute.xlu0 %20 }
  0x86   :  { %v49_v33 = vadd.f32 %v47_v28, %v21_v30  ;;  %v50_v34 = vadd.f32 %v48_v29, %v21_v30  ;;  %v79_v35 = vpop.permute.xlu1 %78 }
  0x87   :  { %v99_v36 = vmul.f32 %v94_v26, %v79_v35  ;;  %v100_v37 = vmul.f32 %v98_v27, %v79_v35 }
  0x88   :  { %v75_v38 = vadd.f32 %v73_v31, %v49_v33  ;;  %v76_v39 = vadd.f32 %v74_v32, %v50_v34 }
  0x8a   :  { %v101_v40 = vadd.f32 %v99_v36, %v75_v38  ;;  %v102_v41 = vadd.f32 %v100_v37, %v76_v39 }
  0x8c   :  { %103 = vst [vmem:[#allocation2] sm:$0xff] %v101_v40  ;;  %104 = vst [vmem:[#allocation2 + $0x8] sm:$0xff] %v102_v41 }
  0x8d   :  { %138 = shalt.err (!%p135_p4)
}
  0x8e   :  { %s139_s20 = scalar_lea.hbm %s199_s3, 256 }
  0x8f   :  { %p140_p5 = scmp.ne.s32.totalorder %s199_s3, %s139_s20  ;;  %p143_p6 = scmp.lt.u32.totalorder %s139_s20, %s199_s3 }
  0x91   :  { %p145_p7 = pnand %p143_p6, %p140_p5 }
  0x93   :  { %148 = shalt.err (!%p145_p7)
}
  0x94   :  { %114 = dma.vmem_to_hbm [thread:$0]  %s112_s2, 256, %s199_s3, [#allocation3]  }
  0x95   :  { %149 = dma.done.wait [#allocation3], 256  }
  0x96   :  { %150 = vsyncadd [#allocation3], 4294967040 }
  0x97   :  { %118 = vsyncpa [#allocation3], 1 }

</bundles_post_ra>
